<compile_context>
chip_gen: v5e
topology: v5e:2x2
jax: 0.10.0
libtpu: 0.0.40
codegen_flags: <defaults>
</compile_context>

<pallas_src>
import functools

import jax
import jax.numpy as jnp
from jax import lax
from jax.experimental import pallas as pl
from jax.experimental.pallas import tpu as pltpu


def _round_up(x: int, m: int) -> int:
    return ((x + m - 1) // m) * m


def _attention_kernel(S, block_s, x_ref, w_ref, b_ref, o_ref, m_sc, l_sc, acc_sc):
    i = pl.program_id(0)

    @pl.when(i == 0)
    def _init():
        m_sc[...] = jnp.full_like(m_sc, -jnp.inf)
        l_sc[...] = jnp.zeros_like(l_sc)
        acc_sc[...] = jnp.zeros_like(acc_sc)

    x = x_ref[...].astype(jnp.float32)          # (block_s, Dp)
    w = w_ref[...].astype(jnp.float32)          # (Dp, 1), resident
    b = b_ref[0]                                # scalar bias from SMEM

    # Linear(embedding_dim, 1) on the MXU: (block_s, Dp) @ (Dp, 1) -> (block_s, 1)
    scores = jnp.dot(x, w, preferred_element_type=jnp.float32,
                     precision=lax.Precision.HIGHEST) + b

    # Mask rows belonging to the zero-padded tail of the sequence.
    row = i * block_s + lax.broadcasted_iota(jnp.int32, (block_s, 1), 0)
    scores = jnp.where(row < S, scores, -1e30)

    # Online softmax update over the sequence axis.
    m_prev = m_sc[...]                                                   # (1, 1)
    m_new = jnp.maximum(m_prev, jnp.max(scores, axis=0, keepdims=True))  # (1, 1)
    alpha = jnp.exp(m_prev - m_new)                                      # (1, 1)
    p = jnp.exp(scores - m_new)                                          # (block_s, 1)

    l_sc[...] = alpha * l_sc[...] + jnp.sum(p, axis=0, keepdims=True)
    # Weighted partial sum on the MXU: contract the sequence dim of p and x,
    # i.e. (1, block_s) @ (block_s, Dp) without materializing a transpose.
    acc_sc[...] = alpha * acc_sc[...] + lax.dot_general(
        p, x, (((0,), (0,)), ((), ())),
        preferred_element_type=jnp.float32, precision=lax.Precision.HIGHEST)
    m_sc[...] = m_new

    @pl.when(i == pl.num_programs(0) - 1)
    def _finalize():
        l = l_sc[...]
        inv = pl.reciprocal(l, approx=True)   # EUP slot (cheap)
        inv = inv * (2.0 - l * inv)           # one Newton step -> ~f32-exact
        o_ref[...] = (acc_sc[...] * inv).astype(o_ref.dtype)


def attention_layer(x, w, b, *, block_s=None, interpret=False):
    """x: (S, D), w: (D,), b: () -> (D,).  Matches AttentionLayer.forward."""
    S, D = x.shape
    Dp = _round_up(D, 128)                    # lane-dense last dim

    if block_s is None:
        # ~8 MiB per x tile (Pallas double-buffers it) -> comfortably inside the
        # v7x 64 MiB VMEM while large enough to hit ~85%+ of HBM roofline.
        target_bytes = 8 * 1024 * 1024
        bs = max(8, (target_bytes // (Dp * 4)) // 8 * 8)
        block_s = min(bs, _round_up(S, 8), 1024)
    block_s = max(8, _round_up(block_s, 8))
    S_pad = _round_up(S, block_s)
    n_steps = S_pad // block_s

    # Zero-pad to lane/sublane friendly shapes; padded rows are masked in-kernel,
    # padded columns contribute zeros and are sliced off below.
    x_p = jnp.zeros((S_pad, Dp), x.dtype).at[:S, :D].set(x)
    w_p = jnp.zeros((Dp, 1), jnp.float32).at[:D, 0].set(w.astype(jnp.float32))
    b_p = jnp.asarray(b, jnp.float32).reshape(1)

    kernel = functools.partial(_attention_kernel, S, block_s)

    out = pl.pallas_call(
        kernel,
        out_shape=jax.ShapeDtypeStruct((1, Dp), x.dtype),
        grid_spec=pltpu.PrefetchScalarGridSpec(
            num_scalar_prefetch=0,
            grid=(n_steps,),
            in_specs=[
                pl.BlockSpec((block_s, Dp), lambda i: (i, 0)),       # streamed x tiles
                pl.BlockSpec((Dp, 1), lambda i: (0, 0)),             # resident weight
                pl.BlockSpec(memory_space=pltpu.MemorySpace.SMEM),   # scalar bias
            ],
            out_specs=pl.BlockSpec((1, Dp), lambda i: (0, 0)),
            scratch_shapes=[
                pltpu.VMEM((1, 1), jnp.float32),    # running max  m
                pltpu.VMEM((1, 1), jnp.float32),    # running sum  l
                pltpu.VMEM((1, Dp), jnp.float32),   # running weighted sum
            ],
        ),
        compiler_params=pltpu.CompilerParams(
            dimension_semantics=("arbitrary",),     # sequential online-softmax axis
            vmem_limit_bytes=48 * 1024 * 1024,      # safe on v7x (64 MiB physical)
        ),
        interpret=interpret,
    )(x_p, w_p, b_p)
    return out[0, :D]


def attention_layer_ref(x, w, b):
    xf = x.astype(jnp.float32)
    scores = jnp.sum(xf * w.astype(jnp.float32)[None, :], axis=1, keepdims=True) + b
    weights = jax.nn.softmax(scores, axis=0)                 # softmax over dim=0
    return jnp.sum(weights * xf, axis=0).astype(x.dtype)     # (D,)


if __name__ == "__main__":
    key = jax.random.PRNGKey(0)
    kx, kw, kb, kx2 = jax.random.split(key, 4)

    # --- Case 1: the module's toy size (seq=8, embedding_dim=32) ---------------
    S1, D1 = 8, 32
    x1 = jax.random.normal(kx, (S1, D1), dtype=jnp.float32)
    w1 = jax.random.normal(kw, (D1,), dtype=jnp.float32) * 0.1
    b1 = jax.random.normal(kb, (), dtype=jnp.float32) * 0.1

    out1 = jax.block_until_ready(attention_layer(x1, w1, b1))
    ref1 = attention_layer_ref(x1, w1, b1)
    assert out1.shape == (D1,)
    assert jnp.allclose(out1, ref1, atol=1e-4, rtol=1e-4), "mismatch (small case)"

    # --- Case 2: multi-tile streaming path (non-aligned S and D) ---------------
    S2, D2 = 300, 200                       # padded to (384, 256), grid of 3 tiles
    x2 = jax.random.normal(kx2, (S2, D2), dtype=jnp.float32)
    w2 = jax.random.normal(kw, (D2,), dtype=jnp.float32) * 0.1
    b2 = b1

    out2 = jax.block_until_ready(attention_layer(x2, w2, b2, block_s=128))
    ref2 = attention_layer_ref(x2, w2, b2)
    assert out2.shape == (D2,)
    assert jnp.allclose(out2, ref2, atol=1e-4, rtol=1e-4), "mismatch (tiled case)"

    print("KERNEL_OK")
</pallas_src>

<mosaic_0001>
module attributes {stable_mosaic.version = 11 : i64} {
  func.func @_attention_kernel(%arg0: i32, %arg1: memref<8x128xf32, #tpu.memory_space<vmem>>, %arg2: memref<128x1xf32, #tpu.memory_space<vmem>>, %arg3: memref<1xf32, #tpu.memory_space<smem>>, %arg4: memref<1x128xf32, #tpu.memory_space<vmem>>, %arg5: memref<1x1xf32, #tpu.memory_space<vmem>>, %arg6: memref<1x1xf32, #tpu.memory_space<vmem>>, %arg7: memref<1x128xf32, #tpu.memory_space<vmem>>) attributes {dimension_semantics = [#tpu.dimension_semantics<arbitrary>], iteration_bounds = array<i64: 1>, scalar_prefetch = 0 : i64, scratch_operands = 3 : i64, tpu.core_type = #tpu.core_type<tc>, window_params = [{transform_indices = @transform_0, window_bounds = array<i64: 8, 128>}, {pipeline_mode = #tpu.pipeline_mode<synchronous>, transform_indices = @transform_1, window_bounds = array<i64: 128, 1>}, {transform_indices = @transform_2, window_bounds = array<i64: 1>}, {pipeline_mode = #tpu.pipeline_mode<synchronous>, transform_indices = @transform_3, window_bounds = array<i64: 1, 128>}]} {
    %c0_i32 = arith.constant 0 : i32
    %0 = arith.cmpi eq, %arg0, %c0_i32 : i32
    %1 = arith.extui %0 : i1 to i32
    %c0_i32_0 = arith.constant 0 : i32
    %2 = arith.cmpi ne, %1, %c0_i32_0 : i32
    scf.if %2 {
      %cst_24 = arith.constant 0xFF800000 : f32
      %42 = vector.broadcast %cst_24 : f32 to vector<1x1xf32>
      %c0_25 = arith.constant 0 : index
      %c0_26 = arith.constant 0 : index
      %43 = vector.load %arg5[%c0_25, %c0_26] : memref<1x1xf32, #tpu.memory_space<vmem>>, vector<1x1xf32>
      tpu.vector_store %arg5[%c0_25, %c0_26], %42 {strides = array<i32>} : memref<1x1xf32, #tpu.memory_space<vmem>>, vector<1x1xf32>,
      %cst_27 = arith.constant 0.000000e+00 : f32
      %44 = vector.broadcast %cst_27 : f32 to vector<1x1xf32>
      %c0_28 = arith.constant 0 : index
      %c0_29 = arith.constant 0 : index
      %45 = vector.load %arg6[%c0_28, %c0_29] : memref<1x1xf32, #tpu.memory_space<vmem>>, vector<1x1xf32>
      tpu.vector_store %arg6[%c0_28, %c0_29], %44 {strides = array<i32>} : memref<1x1xf32, #tpu.memory_space<vmem>>, vector<1x1xf32>,
      %cst_30 = arith.constant 0.000000e+00 : f32
      %46 = vector.broadcast %cst_30 : f32 to vector<1x128xf32>
      %c0_31 = arith.constant 0 : index
      %c0_32 = arith.constant 0 : index
      %47 = vector.load %arg7[%c0_31, %c0_32] : memref<1x128xf32, #tpu.memory_space<vmem>>, vector<1x128xf32>
      tpu.vector_store %arg7[%c0_31, %c0_32], %46 {strides = array<i32>} : memref<1x128xf32, #tpu.memory_space<vmem>>, vector<1x128xf32>,
    } else {
    }
    %c0 = arith.constant 0 : index
    %c0_1 = arith.constant 0 : index
    %3 = vector.load %arg1[%c0, %c0_1] : memref<8x128xf32, #tpu.memory_space<vmem>>, vector<8x128xf32>
    %c0_2 = arith.constant 0 : index
    %c0_3 = arith.constant 0 : index
    %4 = vector.load %arg2[%c0_2, %c0_3] : memref<128x1xf32, #tpu.memory_space<vmem>>, vector<128x1xf32>
    %c0_4 = arith.constant 0 : index
    %5 = memref.load %arg3[%c0_4] : memref<1xf32, #tpu.memory_space<smem>>
    %cst = arith.constant dense<0.000000e+00> : vector<8x1xf32>
    %6 = tpu.matmul %3, %4, %cst {dimension_numbers = #tpu.dot_dimension_numbers<[1], [0], [0], [1], [0, 0, 1, 1], [], []>, precision = #tpu.contract_precision<fp32>} : vector<8x128xf32>, vector<128x1xf32>, vector<8x1xf32> -> vector<8x1xf32>
    %7 = vector.broadcast %5 : f32 to vector<8x1xf32>
    %8 = arith.addf %6, %7 : vector<8x1xf32>
    %c8_i32 = arith.constant 8 : i32
    %9 = arith.muli %arg0, %c8_i32 : i32
    %10 = tpu.iota {dimensions = array<i32: 0>} : vector<8x1xi32>
    %11 = vector.broadcast %9 : i32 to vector<8x1xi32>
    %12 = arith.addi %11, %10 : vector<8x1xi32>
    %c8_i32_5 = arith.constant 8 : i32
    %13 = vector.broadcast %c8_i32_5 : i32 to vector<8x1xi32>
    %14 = arith.cmpi slt, %12, %13 : vector<8x1xi32>
    %cst_6 = arith.constant -1.000000e+30 : f32
    %15 = vector.broadcast %cst_6 : f32 to vector<8x1xf32>
    %16 = arith.select %14, %8, %15 : vector<8x1xi1>, vector<8x1xf32>
    %c0_7 = arith.constant 0 : index
    %c0_8 = arith.constant 0 : index
    %17 = vector.load %arg5[%c0_7, %c0_8] : memref<1x1xf32, #tpu.memory_space<vmem>>, vector<1x1xf32>
    %cst_9 = arith.constant dense<0xFF800000> : vector<1xf32>
    %18 = vector.multi_reduction <maximumf>, %16, %cst_9 [0] : vector<8x1xf32> to vector<1xf32>
    %19 = vector.shape_cast %18 : vector<1xf32> to vector<1x1xf32>
    %20 = arith.maximumf %17, %19 : vector<1x1xf32>
    %21 = arith.subf %17, %20 : vector<1x1xf32>
    %22 = math.exp %21 : vector<1x1xf32>
    %23 = vector.broadcast %20 : vector<1x1xf32> to vector<8x1xf32>
    %24 = arith.subf %16, %23 : vector<8x1xf32>
    %25 = math.exp %24 : vector<8x1xf32>
    %c0_10 = arith.constant 0 : index
    %c0_11 = arith.constant 0 : index
    %26 = vector.load %arg6[%c0_10, %c0_11] : memref<1x1xf32, #tpu.memory_space<vmem>>, vector<1x1xf32>
    %27 = arith.mulf %22, %26 : vector<1x1xf32>
    %cst_12 = arith.constant dense<0.000000e+00> : vector<1xf32>
    %28 = vector.multi_reduction <add>, %25, %cst_12 [0] : vector<8x1xf32> to vector<1xf32>
    %29 = vector.shape_cast %28 : vector<1xf32> to vector<1x1xf32>
    %30 = arith.addf %27, %29 : vector<1x1xf32>
    %c0_13 = arith.constant 0 : index
    %c0_14 = arith.constant 0 : index
    %31 = vector.load %arg6[%c0_13, %c0_14] : memref<1x1xf32, #tpu.memory_space<vmem>>, vector<1x1xf32>
    tpu.vector_store %arg6[%c0_13, %c0_14], %30 {strides = array<i32>} : memref<1x1xf32, #tpu.memory_space<vmem>>, vector<1x1xf32>,
    %c0_15 = arith.constant 0 : index
    %c0_16 = arith.constant 0 : index
    %32 = vector.load %arg7[%c0_15, %c0_16] : memref<1x128xf32, #tpu.memory_space<vmem>>, vector<1x128xf32>
    %33 = vector.broadcast %22 : vector<1x1xf32> to vector<1x128xf32>
    %34 = arith.mulf %33, %32 : vector<1x128xf32>
    %cst_17 = arith.constant dense<0.000000e+00> : vector<1x128xf32>
    %35 = tpu.matmul %25, %3, %cst_17 {dimension_numbers = #tpu.dot_dimension_numbers<[0], [0], [1], [1], [0, 1, 1, 1], [], []>, precision = #tpu.contract_precision<fp32>} : vector<8x1xf32>, vector<8x128xf32>, vector<1x128xf32> -> vector<1x128xf32>
    %36 = arith.addf %34, %35 : vector<1x128xf32>
    %c0_18 = arith.constant 0 : index
    %c0_19 = arith.constant 0 : index
    %37 = vector.load %arg7[%c0_18, %c0_19] : memref<1x128xf32, #tpu.memory_space<vmem>>, vector<1x128xf32>
    tpu.vector_store %arg7[%c0_18, %c0_19], %36 {strides = array<i32>} : memref<1x128xf32, #tpu.memory_space<vmem>>, vector<1x128xf32>,
    %c0_20 = arith.constant 0 : index
    %c0_21 = arith.constant 0 : index
    %38 = vector.load %arg5[%c0_20, %c0_21] : memref<1x1xf32, #tpu.memory_space<vmem>>, vector<1x1xf32>
    tpu.vector_store %arg5[%c0_20, %c0_21], %20 {strides = array<i32>} : memref<1x1xf32, #tpu.memory_space<vmem>>, vector<1x1xf32>,
    %c0_i32_22 = arith.constant 0 : i32
    %39 = arith.cmpi eq, %arg0, %c0_i32_22 : i32
    %40 = arith.extui %39 : i1 to i32
    %c0_i32_23 = arith.constant 0 : i32
    %41 = arith.cmpi ne, %40, %c0_i32_23 : i32
    scf.if %41 {
      %c0_24 = arith.constant 0 : index
      %c0_25 = arith.constant 0 : index
      %42 = vector.load %arg6[%c0_24, %c0_25] : memref<1x1xf32, #tpu.memory_space<vmem>>, vector<1x1xf32>
      %43 = tpu.reciprocal %42 {approx = true} : vector<1x1xf32> -> vector<1x1xf32>
      %44 = arith.mulf %42, %43 : vector<1x1xf32>
      %cst_26 = arith.constant 2.000000e+00 : f32
      %45 = vector.broadcast %cst_26 : f32 to vector<1x1xf32>
      %46 = arith.subf %45, %44 : vector<1x1xf32>
      %47 = arith.mulf %43, %46 : vector<1x1xf32>
      %c0_27 = arith.constant 0 : index
      %c0_28 = arith.constant 0 : index
      %48 = vector.load %arg7[%c0_27, %c0_28] : memref<1x128xf32, #tpu.memory_space<vmem>>, vector<1x128xf32>
      %49 = vector.broadcast %47 : vector<1x1xf32> to vector<1x128xf32>
      %50 = arith.mulf %48, %49 : vector<1x128xf32>
      %c0_29 = arith.constant 0 : index
      %c0_30 = arith.constant 0 : index
      %51 = vector.load %arg4[%c0_29, %c0_30] : memref<1x128xf32, #tpu.memory_space<vmem>>, vector<1x128xf32>
      tpu.vector_store %arg4[%c0_29, %c0_30], %50 {strides = array<i32>} : memref<1x128xf32, #tpu.memory_space<vmem>>, vector<1x128xf32>,
    } else {
    }
    return
  }
  func.func @transform_0(%arg0: i32) -> (i32, i32) {
    %c0_i32 = arith.constant 0 : i32
    %c0_i32_0 = arith.constant 0 : i32
    return %arg0, %c0_i32 : i32, i32
  }
  func.func @transform_1(%arg0: i32) -> (i32, i32) {
    %c0_i32 = arith.constant 0 : i32
    %c0_i32_0 = arith.constant 0 : i32
    %c0_i32_1 = arith.constant 0 : i32
    return %c0_i32, %c0_i32_0 : i32, i32
  }
  func.func @transform_2(%arg0: i32) -> i32 {
    %c0_i32 = arith.constant 0 : i32
    %c0_i32_0 = arith.constant 0 : i32
    return %c0_i32 : i32
  }
  func.func @transform_3(%arg0: i32) -> (i32, i32) {
    %c0_i32 = arith.constant 0 : i32
    %c0_i32_0 = arith.constant 0 : i32
    %c0_i32_1 = arith.constant 0 : i32
    return %c0_i32, %c0_i32_0 : i32, i32
  }
}

</mosaic_0001>

<bundles_post_ra>
// kernel: tpu_custom_call.1
= control target key start
LH: loop header
LB: loop body
LE: loop exit
PB: predicated region body
PF: predicated region fallthrough
CT: control target
= control target key end

     0   :  { %s1023_s0 = inlined_call_operand.vmem [shape: f32[8,128], index: 0, kind: input, shape index: {}]   ;;  %s1024_s1 = inlined_call_operand.vmem [shape: f32[128,1], index: 1, kind: input, shape index: {}]   ;;  %s1025_s2 = inlined_call_operand.<no memory space> [shape: f32[1], index: 2, kind: input, shape index: {}]   ;;  %s1026_s3 = inlined_call_operand.hbm [shape: f32[1,128], index: 3, kind: output, shape index: {}]  }
   0x1   :  { %v40_v0 = vld [vmem:[%s1024_s1 + $0x78] sm:$0xff]  ;;  %v39_v1 = vld [vmem:[%s1024_s1 + $0x70] sm:$0xff]  ;;  %v38_v2 = vld [vmem:[%s1024_s1 + $0x68] sm:$0xff] }
   0x2   :  { %v719_v3 = vand.u32 4294901760, %v40_v0  ;;  %v721_v4 = vand.u32 4294901760, %v39_v1  ;;  %v723_v5 = vand.u32 4294901760, %v38_v2  ;;  %v37_v6 = vld [vmem:[%s1024_s1 + $0x60] sm:$0xff]  ;;  %v36_v7 = vld [vmem:[%s1024_s1 + $0x58] sm:$0xff]  ;;  %v35_v8 = vld [vmem:[%s1024_s1 + $0x50] sm:$0xff] }
   0x3   :  { %v734_v9 = vand.u32 4294901760, %v37_v6  ;;  %v736_v10 = vand.u32 4294901760, %v36_v7  ;;  %v738_v11 = vand.u32 4294901760, %v35_v8  ;;  %v34_v12 = vld [vmem:[%s1024_s1 + $0x48] sm:$0xff]  ;;  %v33_v13 = vld [vmem:[%s1024_s1 + $0x40] sm:$0xff]  ;;  %v32_v21 = vld [vmem:[%s1024_s1 + $0x38] sm:$0xff] }
   0x4   :  { %44 = vmatpush.msra.mxu0 %v719_v3  ;;  %v748_v14 = vsub.f32 %v40_v0, %v719_v3  ;;  %v751_v15 = vsub.f32 %v39_v1, %v721_v4  ;;  %v754_v16 = vsub.f32 %v38_v2, %v723_v5  ;;  %v756_v17 = vand.u32 4294901760, %v34_v12  ;;  %240 = vmatpush.msra.mxu3 %v719_v3 }
   0x5   :  { %v760_v18 = vsub.f32 %v37_v6, %v734_v9  ;;  %v763_v19 = vsub.f32 %v36_v7, %v736_v10  ;;  %v765_v20 = vand.u32 4294901760, %v33_v13  ;;  %v775_v25 = vsub.f32 %v35_v8, %v738_v11 }
   0x6   :  { %46 = vmatpush.msra.mxu0 %v721_v4  ;;  %v86_v22 = vand.u32 4294901760, %v748_v14  ;;  %v92_v23 = vand.u32 4294901760, %v751_v15  ;;  %v98_v24 = vand.u32 4294901760, %v754_v16  ;;  %187 = vmatpush.msra.mxu2 %v748_v14 }
   0x7   :  { %9 = vsyncpa [#allocation7], 0  ;;  %v104_v26 = vand.u32 4294901760, %v760_v18  ;;  %v110_v27 = vand.u32 4294901760, %v763_v19  ;;  %v781_v28 = vsub.f32 %v34_v12, %v756_v17  ;;  %242 = vmatpush.msra.mxu3 %v721_v4  ;;  %v794_v32 = vand.u32 4294901760, %v32_v21  ;;  %v31_v34 = vld [vmem:[%s1024_s1 + $0x30] sm:$0xff] }
   0x8   :  { %v87_v29 = vsub.f32 %v748_v14, %v86_v22  ;;  %48 = vmatpush.msra.mxu0 %v723_v5  ;;  %v93_v30 = vsub.f32 %v751_v15, %v92_v23  ;;  %v99_v31 = vsub.f32 %v754_v16, %v98_v24  ;;  %190 = vmatpush.msra.mxu2 %v751_v15  ;;  %v30_v35 = vld [vmem:[%s1024_s1 + $0x28] sm:$0xff]  ;;  %v116_v39 = vand.u32 4294901760, %v775_v25  ;;  %v29_v42 = vld [vmem:[%s1024_s1 + $0x20] sm:$0xff]  ;;  %v28_v47 = vld [vmem:[%s1024_s1 + $0x18] sm:$0xff]  ;;  %s639_s22 = sshll.u32 %s1026_s3, 4  ;;  %s640_s22 = int_to_ptr.hbm [resolvable:$true] %s639_s22 }
   0x9   :  { %v798_v33 = vsub.f32 %v33_v13, %v765_v20  ;;  %244 = vmatpush.msra.mxu3 %v723_v5  ;;  %v105_v38 = vsub.f32 %v760_v18, %v104_v26  ;;  %v111_v40 = vsub.f32 %v763_v19, %v110_v27  ;;  %v122_v41 = vand.u32 4294901760, %v781_v28  ;;  %v27_v53 = vld [vmem:[%s1024_s1 + $0x10] sm:$0xff]  ;;  %v26_v61 = vld [vmem:[%s1024_s1 + $0x8] sm:$0xff]  ;;  %v25_v2 = vld [vmem:[%s1024_s1] sm:$0xff] }
   0xa   :  { %v88_v36 = vand.u32 4294901760, %v87_v29  ;;  %v94_v37 = vand.u32 4294901760, %v93_v30  ;;  %50 = vmatpush.msra.mxu0 %v734_v9  ;;  %193 = vmatpush.msra.mxu2 %v754_v16  ;;  %v100_v43 = vand.u32 4294901760, %v99_v31  ;;  %v822_v44 = vand.u32 4294901760, %v31_v34  ;;  %v24_v29 = vld [vmem:[%s1023_s0] sm:$0xff] }
   0xb   :  { %246 = vmatpush.msra.mxu3 %v734_v9  ;;  %v825_v45 = vsub.f32 %v32_v21, %v794_v32  ;;  %v827_v46 = vand.u32 4294901760, %v30_v35  ;;  %v128_v48 = vand.u32 4294901760, %v798_v33  ;;  %v106_v49 = vand.u32 4294901760, %v105_v38 }
   0xc   :  { %89 = vmatpush.msra.mxu1 %v88_v36  ;;  %52 = vmatpush.msra.mxu0 %v736_v10  ;;  %v117_v50 = vsub.f32 %v775_v25, %v116_v39  ;;  %v840_v51 = vsub.f32 %v31_v34, %v822_v44  ;;  %v842_v52 = vand.u32 4294901760, %v29_v42  ;;  %v847_v54 = vand.u32 4294901760, %v28_v47 }
   0xd   :  { %196 = vmatpush.msra.mxu2 %v760_v18  ;;  %248 = vmatpush.msra.mxu3 %v736_v10  ;;  %v112_v55 = vand.u32 4294901760, %v111_v40  ;;  %v123_v56 = vsub.f32 %v781_v28, %v122_v41  ;;  %v134_v57 = vand.u32 4294901760, %v825_v45  ;;  %v857_v58 = vsub.f32 %v30_v35, %v827_v46 }
   0xe   :  { %95 = vmatpush.msra.mxu1 %v94_v37  ;;  %54 = vmatpush.msra.mxu0 %v738_v11  ;;  %v129_v59 = vsub.f32 %v798_v33, %v128_v48  ;;  %v862_v60 = vand.u32 4294901760, %v27_v53  ;;  %v118_v62 = vand.u32 4294901760, %v117_v50  ;;  %v140_v63 = vand.u32 4294901760, %v840_v51 }
   0xf   :  { %199 = vmatpush.msra.mxu2 %v763_v19  ;;  %250 = vmatpush.msra.mxu3 %v738_v11  ;;  %v872_v0 = vsub.f32 %v29_v42, %v842_v52  ;;  %v875_v1 = vsub.f32 %v28_v47, %v847_v54  ;;  %v124_v6 = vand.u32 4294901760, %v123_v56  ;;  %v135_v7 = vsub.f32 %v825_v45, %v134_v57 }
  0x10   :  { %101 = vmatpush.msra.mxu1 %v100_v43  ;;  %56 = vmatpush.msra.mxu0 %v756_v17  ;;  %v146_v8 = vand.u32 4294901760, %v857_v58  ;;  %v887_v12 = vand.u32 4294901760, %v26_v61  ;;  %v130_v13 = vand.u32 4294901760, %v129_v59  ;;  %v890_v21 = vsub.f32 %v27_v53, %v862_v60 }
  0x11   :  { %202 = vmatpush.msra.mxu2 %v775_v25  ;;  %252 = vmatpush.msra.mxu3 %v756_v17  ;;  %v141_v30 = vsub.f32 %v840_v51, %v140_v63  ;;  %v152_v31 = vand.u32 4294901760, %v872_v0  ;;  %v902_v34 = vand.u32 4294901760, %v25_v2  ;;  %v904_v35 = vand.u32 4294901760, %v24_v29 }
  0x12   :  { %107 = vmatpush.msra.mxu1 %v106_v49  ;;  %58 = vmatpush.msra.mxu0 %v765_v20  ;;  %v158_v36 = vand.u32 4294901760, %v875_v1  ;;  %v136_v37 = vand.u32 4294901760, %v135_v7  ;;  %v147_v38 = vsub.f32 %v857_v58, %v146_v8  ;;  %v914_v40 = vsub.f32 %v26_v61, %v887_v12 }
  0x13   :  { %205 = vmatpush.msra.mxu2 %v781_v28  ;;  %254 = vmatpush.msra.mxu3 %v765_v20  ;;  %v76_v42 = vsub.f32 %v24_v29, %v904_v35  ;;  %v142_v43 = vand.u32 4294901760, %v141_v30  ;;  %v153_v47 = vsub.f32 %v872_v0, %v152_v31  ;;  %v164_v49 = vand.u32 4294901760, %v890_v21 }
  0x14   :  { %113 = vmatpush.msra.mxu1 %v112_v55  ;;  %60 = vmatpush.msra.mxu0 %v794_v32  ;;  %v925_v50 = vsub.f32 %v25_v2, %v902_v34  ;;  %v148_v53 = vand.u32 4294901760, %v147_v38  ;;  %v159_v55 = vsub.f32 %v875_v1, %v158_v36  ;;  %v170_v56 = vand.u32 4294901760, %v914_v40 }
  0x15   :  { %208 = vmatpush.msra.mxu2 %v798_v33  ;;  %256 = vmatpush.msra.mxu3 %v794_v32  ;;  %v934_v59 = vand.u32 4294901760, %v76_v42  ;;  %v154_v61 = vand.u32 4294901760, %v153_v47  ;;  %vm20_vm0 = vcmask 0   ;;  %vm392_vm1 = vcmask 7168  }
  0x16   :  { %119 = vmatpush.msra.mxu1 %v118_v62  ;;  %62 = vmatpush.msra.mxu0 %v822_v44  ;;  %v165_v62 = vsub.f32 %v890_v21, %v164_v49  ;;  %v176_v2 = vand.u32 4294901760, %v925_v50  ;;  %v171_v7 = vsub.f32 %v914_v40, %v170_v56  ;;  %vm462_vm2 = vcmask 64512  }
  0x17   :  { %211 = vmatpush.msra.mxu2 %v825_v45  ;;  %258 = vmatpush.msra.mxu3 %v822_v44 }
  0x18   :  { %125 = vmatpush.msra.mxu1 %v124_v6  ;;  %64 = vmatpush.msra.mxu0 %v827_v46  ;;  %v160_v6 = vand.u32 4294901760, %v159_v55  ;;  %v166_v29 = vand.u32 4294901760, %v165_v62  ;;  %v177_v30 = vsub.f32 %v925_v50, %v176_v2 }
  0x19   :  { %214 = vmatpush.msra.mxu2 %v840_v51  ;;  %260 = vmatpush.msra.mxu3 %v827_v46 }
  0x1a   :  { %131 = vmatpush.msra.mxu1 %v130_v13  ;;  %66 = vmatpush.msra.mxu0 %v842_v52  ;;  %v78_v13 = vsub.f32 %v76_v42, %v934_v59 }
  0x1b   :  { %217 = vmatpush.msra.mxu2 %v857_v58  ;;  %262 = vmatpush.msra.mxu3 %v842_v52 }
  0x1c   :  { %137 = vmatpush.msra.mxu1 %v136_v37  ;;  %68 = vmatpush.msra.mxu0 %v847_v54  ;;  %v172_v37 = vand.u32 4294901760, %v171_v7  ;;  %v79_v38 = vand.u32 4294901760, %v78_v13 }
  0x1d   :  { %220 = vmatpush.msra.mxu2 %v872_v0  ;;  %264 = vmatpush.msra.mxu3 %v847_v54 }
  0x1e   :  { %143 = vmatpush.msra.mxu1 %v142_v43  ;;  %70 = vmatpush.msra.mxu0 %v862_v60  ;;  %v178_v43 = vand.u32 4294901760, %v177_v30 }
  0x1f   :  { %223 = vmatpush.msra.mxu2 %v875_v1  ;;  %266 = vmatpush.msra.mxu3 %v862_v60 }
  0x20   :  { %149 = vmatpush.msra.mxu1 %v148_v53  ;;  %72 = vmatpush.msra.mxu0 %v887_v12 }
  0x21   :  { %226 = vmatpush.msra.mxu2 %v890_v21  ;;  %268 = vmatpush.msra.mxu3 %v887_v12 }
  0x22   :  { %155 = vmatpush.msra.mxu1 %v154_v61  ;;  %74 = vmatpush.msra.mxu0 %v902_v34 }
  0x23   :  { %229 = vmatpush.msra.mxu2 %v914_v40  ;;  %270 = vmatpush.msra.mxu3 %v902_v34 }
  0x24   :  { %281 = vmatpush.msrb.mxu0 %v86_v22  ;;  %161 = vmatpush.msra.mxu1 %v160_v6 }
  0x25   :  { %232 = vmatpush.msra.mxu2 %v925_v50  ;;  %274 = vmatmul.f32.vlgmr.msra.gmra.mxu3 %v934_v59 }
  0x26   :  { %285 = vmatpush.msrb.mxu0 %v92_v23  ;;  %167 = vmatpush.msra.mxu1 %v166_v29 }
  0x27   :  { %235 = vmatmul.f32.vlgmr.msra.gmra.mxu2 %v76_v42  ;;  %80 = vmatmul.f32.vlgmr.msra.gmra.mxu0 %v79_v38 }
  0x28   :  { %289 = vmatpush.msrb.mxu0 %v98_v24  ;;  %173 = vmatpush.msra.mxu1 %v172_v37 }
  0x29   :  { %512 = vmatpush.msrb.mxu3 %v79_v38  ;;  %482 = vmatpush.msrb.mxu2 %v904_v35 }
  0x2a   :  { %293 = vmatpush.msrb.mxu0 %v104_v26  ;;  %179 = vmatpush.msra.mxu1 %v178_v43 }
  0x2b   :  { %181 = vmatmul.f32.vlgmr.msra.gmra.mxu1 %v904_v35  ;;  %558 = vmatpush.msra.mxu3 %v904_v35 }
  0x2c   :  { %348 = vmatpush.msrb.mxu1 %v719_v3  ;;  %297 = vmatpush.msrb.mxu0 %v110_v27  ;;  %v686_v3 = vmov -inf  }
  0x2d   :  { %535 = vmatpush.msra.mxu2 %v76_v42  ;;  %21 = vst.msk [vmem:[#allocation2] sm:$0x1] %vm20_vm0, %v686_v3 }
  0x2e   :  { %350 = vmatpush.msrb.mxu1 %v721_v4  ;;  %301 = vmatpush.msrb.mxu0 %v116_v39  ;;  %v687_v4 = vmov 0.0  }
  0x2f   :  { %22 = vst.msk [vmem:[#allocation3] sm:$0x1] %vm20_vm0, %v687_v4 }
  0x30   :  { %352 = vmatpush.msrb.mxu1 %v723_v5  ;;  %305 = vmatpush.msrb.mxu0 %v122_v41  ;;  %23 = vst [vmem:[#allocation4] sm:$0x1] %v687_v4  ;;  %v42_v5 = vstv %s1025_s2  ;;  %v688_v41 = vmov 0   ;;  %s689_s2 = smov [#allocation6]  }
  0x31   :  { %653 = vset.pattern.permute.xlu1 %v688_v41  ;;  %s637_s19 = sshll.u32 %s689_s2, 4  ;;  %s638_s19 = int_to_ptr.vmem [resolvable:$true] %s637_s19 }
  0x32   :  { %354 = vmatpush.msrb.mxu1 %v734_v9  ;;  %309 = vmatpush.msrb.mxu0 %v128_v48 }
  0x34   :  { %356 = vmatpush.msrb.mxu1 %v736_v10  ;;  %313 = vmatpush.msrb.mxu0 %v134_v57  ;;  %v391_v33 = vld [vmem:[#allocation2] sm:$0x1] }
  0x36   :  { %358 = vmatpush.msrb.mxu1 %v738_v11  ;;  %317 = vmatpush.msrb.mxu0 %v140_v63 }
  0x38   :  { %360 = vmatpush.msrb.mxu1 %v756_v17  ;;  %321 = vmatpush.msrb.mxu0 %v146_v8  ;;  %v410_v8 = vld [vmem:[#allocation3] sm:$0x1] }
  0x3a   :  { %362 = vmatpush.msrb.mxu1 %v765_v20  ;;  %325 = vmatpush.msrb.mxu0 %v152_v31 }
  0x3c   :  { %364 = vmatpush.msrb.mxu1 %v794_v32  ;;  %329 = vmatpush.msrb.mxu0 %v158_v36 }
  0x3e   :  { %366 = vmatpush.msrb.mxu1 %v822_v44  ;;  %333 = vmatpush.msrb.mxu0 %v164_v49 }
  0x40   :  { %368 = vmatpush.msrb.mxu1 %v827_v46  ;;  %337 = vmatpush.msrb.mxu0 %v170_v56 }
  0x42   :  { %370 = vmatpush.msrb.mxu1 %v842_v52  ;;  %341 = vmatpush.msrb.mxu0 %v176_v2 }
  0x43   :  { %343 = vmatmul.f32.vlgmr.msrb.gmra.mxu0 %v904_v35 }
  0x44   :  { %372 = vmatpush.msrb.mxu1 %v847_v54 }
  0x46   :  { %374 = vmatpush.msrb.mxu1 %v862_v60 }
  0x48   :  { %376 = vmatpush.msrb.mxu1 %v887_v12 }
  0x4a   :  { %378 = vmatpush.msrb.mxu1 %v902_v34 }
  0x4b   :  { %380 = vmatmul.f32.vlgmr.msrb.gmra.mxu1 %v904_v35 }
  0xa4   :  { %v81_v9 = vpop.f32.mrf.mxu0 }
  0xa5   :  { %v82_v10 = vadd.f32 %v81_v9, %v42_v5 }
  0xa8   :  { %v182_v11 = vpop.f32.mrf.mxu1  ;;  %v275_v17 = vpop.f32.mrf.mxu3 }
  0xa9   :  { %v183_v14 = vadd.f32 %v182_v11, %v82_v10 }
  0xaa   :  { %v236_v15 = vpop.f32.mrf.mxu2 }
  0xab   :  { %v237_v16 = vadd.f32 %v236_v15, %v183_v14 }
  0xad   :  { %v276_v18 = vadd.f32 %v275_v17, %v237_v16 }
  0xc0   :  { %v344_v19 = vpop.f32.mrf.mxu0 }
  0xc1   :  { %v345_v20 = vadd.f32 %v344_v19, %v276_v18 }
  0xc8   :  { %v381_v22 = vpop.f32.mrf.mxu1 }
  0xc9   :  { %v382_v23 = vadd.f32 %v381_v22, %v345_v20 }
  0xcb   :  { %v393_v24 = vsel %vm392_vm1, %v382_v23, -inf }
  0xcc   :  { %v394_v25 = vrot.slane %v393_v24, 4 }
  0xce   :  { %v395_v26 = vmax.f32 %v393_v24, %v394_v25 }
  0xd0   :  { %v396_v27 = vrot.slane %v395_v26, 2 }
  0xd2   :  { %v397_v28 = vmax.f32 %v395_v26, %v396_v27 }
  0xd4   :  { %v398_v32 = vrot.slane %v397_v28, 1 }
  0xd6   :  { %v399_v39 = vmax.f32 %v397_v28, %v398_v32 }
  0xd8   :  { %v400_v44 = vmax.f32 %v391_v33, %v399_v39 }
  0xda   :  { %v405_v45 = vperm.slane %v400_v44, 0  ;;  %614 = vst.msk [vmem:[#allocation2] sm:$0x1] %vm20_vm0, %v400_v44  ;;  %v401_v51 = vsub.f32 %v391_v33, %v400_v44 }
  0xdc   :  { %v407_v46 = vsub.f32 %v382_v23, %v405_v45  ;;  %v402_v52 = vmul.f32 1.442695, %v401_v51 }
  0xde   :  { %v408_v48 = vmul.f32 1.442695, %v407_v46 }
  0xe0   :  { %654 = vpow2.f32 %v408_v48 }
  0xe1   :  { %656 = vpow2.f32 %v402_v52 }
  0xe6   :  { %v655_v54 = vpop.eup %654 }
  0xe7   :  { %v412_v57 = vsel %vm392_vm1, %v655_v54, 0.0  ;;  %430 = vxpose.xlu0.b32.start.end [1/1] (short) (narrow) %v655_v54, 8  ;;  %v657_v1 = vpop.eup %656 }
  0xe8   :  { %v413_v58 = vrot.slane %v412_v57, 4  ;;  %v411_v21 = vmul.f32 %v657_v1, %v410_v8 }
  0xea   :  { %v414_v60 = vadd.f32 %v413_v58, %v412_v57 }
  0xec   :  { %v415_v63 = vrot.slane %v414_v60, 2 }
  0xee   :  { %v416_v0 = vadd.f32 %v415_v63, %v414_v60 }
  0xf0   :  { %v417_v12 = vrot.slane %v416_v0, 1 }
  0xf2   :  { %v418_v31 = vadd.f32 %v417_v12, %v416_v0 }
  0xf4   :  { %v419_v34 = vadd.f32 %v418_v31, %v411_v21 }
  0xf6   :  { %421 = vst.msk [vmem:[#allocation3] sm:$0x1] %vm20_vm0, %v419_v34 }
  0xfd   :  { %v618_v36 = vld [vmem:[#allocation3] sm:$0x1] }
  0xfe   :  { %658 = vrcp.f32 %v618_v36 }
 0x104   :  { %v659_v40 = vpop.eup %658 }
 0x105   :  { %v620_v42 = vmul.f32 %v659_v40, %v618_v36 }
 0x107   :  { %v621_v47 = vsub.f32 2.0, %v620_v42 }
 0x109   :  { %v622_v49 = vmul.f32 %v659_v40, %v621_v47 }
 0x10b   :  { %626 = vperm.xlu1 %653, %v622_v49  }
 0x14e   :  { %652 = vset.pattern.permute.xlu0 %v688_v41 }
 0x155   :  { %425 = vperm.xlu0 %652, %v657_v1  }
 0x18b   :  { %v446_v50 = vpop.trf.xlu0 }
 0x18c   :  { %v464_v53 = vsel %vm462_vm2, %v446_v50, 0 }
 0x18d   :  { %v483_v55 = vand.u32 4294901760, %v464_v53 }
 0x18f   :  { %v484_v56 = vsub.f32 %v464_v53, %v483_v55  ;;  %514 = vmatmul.f32.vlgmr.msrb.gmra.mxu3 %v483_v55 }
 0x190   :  { %606 = vmatpush.msrb.mxu3 %v904_v35  ;;  %v422_v35 = vld [vmem:[#allocation4] sm:$0x1] }
 0x191   :  { %v485_v61 = vand.u32 4294901760, %v484_v56 }
 0x193   :  { %v486_v62 = vsub.f32 %v484_v56, %v485_v61 }
 0x195   :  { %v487_v2 = vand.u32 4294901760, %v486_v62 }
 0x197   :  { %488 = vmatmul.f32.vlgmr.msrb.gmra.mxu2 %v487_v2  ;;  %562 = vmatmul.f32.vlgmr.msra.gmra.mxu3 %v485_v61 }
 0x198   :  { %584 = vmatpush.msrb.mxu2 %v934_v59  ;;  %v627_v59 = vpop.permute.xlu1 %626 }
 0x199   :  { %v629_v15 = vperm.slane %v627_v59, 0 }
 0x19f   :  { %538 = vmatmul.f32.vlgmr.msra.gmra.mxu2 %v484_v56  ;;  %608 = vmatmul.f32.vlgmr.msrb.gmra.mxu3 %v483_v55 }
 0x1a7   :  { %586 = vmatmul.f32.vlgmr.msrb.gmra.mxu2 %v483_v55 }
 0x1c7   :  { %v426_v38 = vpop.permute.xlu0 %425 }
 0x1c8   :  { %v428_v43 = vperm.slane %v426_v38, 0 }
 0x1ca   :  { %v429_v10 = vmul.f32 %v428_v43, %v422_v35 }
 0x212   :  { %v515_v6 = vpop.f32.mrf.mxu3 }
 0x21a   :  { %v489_v7 = vpop.f32.mrf.mxu2  ;;  %v563_v13 = vpop.f32.mrf.mxu3 }
 0x21b   :  { %v516_v30 = vadd.f32 %v515_v6, %v489_v7 }
 0x222   :  { %v539_v29 = vpop.f32.mrf.mxu2  ;;  %v609_v9 = vpop.f32.mrf.mxu3 }
 0x223   :  { %v540_v37 = vadd.f32 %v539_v29, %v516_v30 }
 0x225   :  { %v564_v3 = vadd.f32 %v563_v13, %v540_v37 }
 0x22a   :  { %v587_v4 = vpop.f32.mrf.mxu2 }
 0x22b   :  { %v588_v5 = vadd.f32 %v587_v4, %v564_v3 }
 0x22d   :  { %v610_v11 = vadd.f32 %v609_v9, %v588_v5 }
 0x22f   :  { %v612_v14 = vadd.f32 %v610_v11, %v429_v10 }
 0x231   :  { %613 = vst [vmem:[#allocation4] sm:$0x1] %v612_v14 }
 0x238   :  { %v623_v16 = vld [vmem:[#allocation4] sm:$0x1] }
 0x239   :  { %v630_v17 = vmul.f32 %v629_v15, %v623_v16 }
 0x23b   :  { %631 = vst [vmem:[#allocation6] sm:$0x1] %v630_v17 }
 0x23c   :  { %642 = dma.vmem_to_hbm [thread:$0]  %s638_s19, 16, %s640_s22, [#allocation7]  }
 0x23d   :  { %684 = dma.done.wait [#allocation7], 16  }
 0x23e   :  { %685 = vsyncadd [#allocation7], 4294967280 }
 0x23f   :  { %647 = vsyncpa [#allocation7], 1 }

</bundles_post_ra>
